<compile_context>
chip_gen: v7x
topology: tpu7x:2x2x1
jax: 0.10.0
libtpu: 0.0.40
codegen_flags: <defaults>
</compile_context>

<pallas_src>
import functools

import jax
import jax.numpy as jnp
from jax.experimental import pallas as pl
from jax.experimental.pallas import tpu as pltpu


def _pa_kernel(f_ref, p_ref, w1_ref, b1_ref, w2_ref, b2_ref, o_ref, *, W, nb):
    """Fused PA forward for `nb` images.

    f_ref, p_ref : (nb, C, HW) f32   feature / para maps, pixels on lanes
    w1_ref       : (C, 9*2C)  bf16   conv1 weight, cols ordered (dy, dx, cin)
    b1_ref       : (C, 1)     f32    conv1 bias
    w2_ref       : (C, 9*C)   bf16   conv2 weight
    b2_ref       : (C, 1)     f32    conv2 bias
    o_ref        : (nb, C, HW) f32   output (lane-dense; wrapper reshape free)
    """
    HW = f_ref.shape[2]

    # Column-validity masks for the horizontal taps. Computed once and reused
    # by both convs and every image in the block.
    col = jax.lax.broadcasted_iota(jnp.int32, (1, HW), 1) % W
    has_left = col > 0           # source column c-1 exists
    has_right = col < (W - 1)    # source column c+1 exists

    w1 = w1_ref[...]
    b1 = b1_ref[...]
    w2 = w2_ref[...]
    b2 = b2_ref[...]

    def im2col(x):
        """x: (Cin, HW) -> (9*Cin, HW); taps ordered (dy, dx), cin minor.

        tap[(dy*3+dx)*Cin + i, p] = x[i, p + (dy-1)*W + (dx-1)], or 0 when the
        source pixel falls outside the HxW image ('same' zero padding).
        Vertical out-of-range is handled by the zero fill of the lane shift;
        horizontal neighbours additionally need the column mask. Pure lane
        shifts + selects: no scratch buffers, no memsets, no relayouts of a
        channels-on-lanes tile.
        """
        taps = []
        for dy in range(3):
            for dx in range(3):
                s = (dy - 1) * W + (dx - 1)
                if s > 0:
                    t = jnp.concatenate(
                        [x[:, s:], jnp.zeros((x.shape[0], s), x.dtype)],
                        axis=1)
                elif s < 0:
                    t = jnp.concatenate(
                        [jnp.zeros((x.shape[0], -s), x.dtype), x[:, :HW + s]],
                        axis=1)
                else:
                    t = x
                if dx == 0:
                    t = jnp.where(has_left, t, jnp.zeros_like(t))
                elif dx == 2:
                    t = jnp.where(has_right, t, jnp.zeros_like(t))
                taps.append(t)
        return jnp.concatenate(taps, axis=0)

    for n in range(nb):                        # static unroll over the block
        f_img = f_ref[n]                                       # (C, HW)  f32
        x_cat = jnp.concatenate([f_img, p_ref[n]], axis=0)     # (2C, HW) f32

        # conv1 + bias + LeakyReLU(0.2): one MXU pass, result already (C, HW).
        patch1 = im2col(x_cat).astype(jnp.bfloat16)            # (9*2C, HW)
        h1 = jnp.dot(w1, patch1, preferred_element_type=jnp.float32) + b1
        h1 = jnp.where(h1 >= 0.0, h1, 0.2 * h1)

        # conv2 + bias: second single MXU pass.
        patch2 = im2col(h1).astype(jnp.bfloat16)               # (9*C, HW)
        h2 = jnp.dot(w2, patch2, preferred_element_type=jnp.float32) + b2

        # Exact sigmoid (EUP exp + VPU divide) and the gating multiply.
        mul = 1.0 / (1.0 + jnp.exp(-h2))
        o_ref[n] = (f_img * mul).astype(o_ref.dtype)


def _images_per_step(n):
    """Images per grid step.

    Batch images per step to amortize per-step overhead / tiny DMAs, but keep
    at least 2 grid steps when N >= 2 so the "parallel" axis can shard across
    v7x's two TensorCores (irrelevant but harmless on v5e/v6e).
    """
    if n <= 2:
        return 1
    for nb in range(min(n // 2, 8), 0, -1):
        if n % nb == 0:
            return nb
    return 1


def _pa_pallas(f_flat, p_flat, w1_mat, b1_2d, w2_mat, b2_2d, W):
    N, C, HW = f_flat.shape
    nb = _images_per_step(N)
    grid = (N // nb,)

    kernel = functools.partial(_pa_kernel, W=W, nb=nb)

    return pl.pallas_call(
        kernel,
        out_shape=jax.ShapeDtypeStruct((N, C, HW), f_flat.dtype),
        grid=grid,
        in_specs=[
            pl.BlockSpec((nb, C, HW), lambda i: (i, 0, 0)),
            pl.BlockSpec((nb, C, HW), lambda i: (i, 0, 0)),
            pl.BlockSpec(w1_mat.shape, lambda i: (0, 0)),
            pl.BlockSpec(b1_2d.shape, lambda i: (0, 0)),
            pl.BlockSpec(w2_mat.shape, lambda i: (0, 0)),
            pl.BlockSpec(b2_2d.shape, lambda i: (0, 0)),
        ],
        out_specs=pl.BlockSpec((nb, C, HW), lambda i: (i, 0, 0)),
        compiler_params=pltpu.CompilerParams(
            dimension_semantics=("parallel",),
            # Explicit, generation-safe VMEM budget (v5e scoped default is
            # only 16 MiB; v7x has 64 MiB physical). Per-step footprint here
            # is a few hundred KB, so 32 MiB leaves ample double-buffer room.
            vmem_limit_bytes=32 * 1024 * 1024,
        ),
    )(f_flat, p_flat, w1_mat, b1_2d, w2_mat, b2_2d)


def pa_forward(feature_maps, para_maps, w1_oihw, b1, w2_oihw, b2):
    """PA.forward. Inputs/outputs are NCHW like the PyTorch module.

    feature_maps, para_maps: (N, C, H, W)
    w1_oihw: (C, 2C, 3, 3)   b1: (C,)
    w2_oihw: (C, C, 3, 3)    b2: (C,)
    returns: (N, C, H, W)
    """
    N, C, H, W = feature_maps.shape
    HW = H * W

    # Free (layout-preserving) reshapes: NCHW -> NC(HW). No transposes.
    f_flat = feature_maps.reshape(N, C, HW)
    p_flat = para_maps.reshape(N, C, HW)

    # Pre-flatten weights to matmul-ready LHS (Cout, 9*Cin), bf16 for the MXU.
    # Column ordering = (ky, kx, cin), matching the in-kernel im2col order.
    w1_mat = jnp.transpose(w1_oihw, (0, 2, 3, 1)).reshape(C, 9 * 2 * C)
    w2_mat = jnp.transpose(w2_oihw, (0, 2, 3, 1)).reshape(C, 9 * C)
    w1_mat = w1_mat.astype(jnp.bfloat16)
    w2_mat = w2_mat.astype(jnp.bfloat16)
    b1_2d = b1.reshape(C, 1).astype(jnp.float32)
    b2_2d = b2.reshape(C, 1).astype(jnp.float32)

    out_flat = _pa_pallas(f_flat, p_flat, w1_mat, b1_2d, w2_mat, b2_2d, W)
    return out_flat.reshape(N, C, H, W)        # free reshape back to NCHW


def _reference_forward(feature_maps, para_maps, w1, b1, w2, b2):
    """Pure-JAX reference (lax convs, f32) for the correctness check."""
    x = jnp.concatenate([feature_maps, para_maps], axis=1)
    h = jax.lax.conv_general_dilated(
        x, w1, window_strides=(1, 1), padding=((1, 1), (1, 1)),
        dimension_numbers=("NCHW", "OIHW", "NCHW"),
    ) + b1[None, :, None, None]
    h = jnp.where(h >= 0.0, h, 0.2 * h)
    h = jax.lax.conv_general_dilated(
        h, w2, window_strides=(1, 1), padding=((1, 1), (1, 1)),
        dimension_numbers=("NCHW", "OIHW", "NCHW"),
    ) + b2[None, :, None, None]
    return feature_maps * jax.nn.sigmoid(h)


if __name__ == "__main__":
    # Small shapes consistent with the module: n_feats=4, 16x16 maps, batch 2.
    N, C, H, W = 2, 4, 16, 16

    key = jax.random.PRNGKey(0)
    kf, kp, kw1, kb1, kw2, kb2 = jax.random.split(key, 6)
    feature = jax.random.normal(kf, (N, C, H, W), dtype=jnp.float32)
    para = jax.random.normal(kp, (N, C, H, W), dtype=jnp.float32)
    w1 = 0.1 * jax.random.normal(kw1, (C, 2 * C, 3, 3), dtype=jnp.float32)
    b1 = 0.1 * jax.random.normal(kb1, (C,), dtype=jnp.float32)
    w2 = 0.1 * jax.random.normal(kw2, (C, C, 3, 3), dtype=jnp.float32)
    b2 = 0.1 * jax.random.normal(kb2, (C,), dtype=jnp.float32)

    out = jax.block_until_ready(pa_forward(feature, para, w1, b1, w2, b2))
    ref = jax.block_until_ready(_reference_forward(feature, para, w1, b1, w2, b2))

    assert out.shape == (N, C, H, W), out.shape
    # bf16 MXU inputs -> relaxed tolerance vs the f32 reference.
    assert jnp.allclose(out, ref, atol=2e-2, rtol=2e-2), \
        float(jnp.max(jnp.abs(out - ref)))

    print("KERNEL_OK")
</pallas_src>

<mosaic_0001>
module attributes {stable_mosaic.version = 11 : i64} {
  func.func @_pa_kernel(%arg0: i32, %arg1: memref<1x4x256xf32, #tpu.memory_space<vmem>>, %arg2: memref<1x4x256xf32, #tpu.memory_space<vmem>>, %arg3: memref<4x72xbf16, #tpu.memory_space<vmem>>, %arg4: memref<4x1xf32, #tpu.memory_space<vmem>>, %arg5: memref<4x36xbf16, #tpu.memory_space<vmem>>, %arg6: memref<4x1xf32, #tpu.memory_space<vmem>>, %arg7: memref<1x4x256xf32, #tpu.memory_space<vmem>>) attributes {dimension_semantics = [#tpu.dimension_semantics<parallel>], iteration_bounds = array<i64: 2>, scalar_prefetch = 0 : i64, scratch_operands = 0 : i64, tpu.core_type = #tpu.core_type<tc>, window_params = [{transform_indices = @transform_0, window_bounds = array<i64: 1, 4, 256>}, {transform_indices = @transform_1, window_bounds = array<i64: 1, 4, 256>}, {pipeline_mode = #tpu.pipeline_mode<synchronous>, transform_indices = @transform_2, window_bounds = array<i64: 4, 72>}, {pipeline_mode = #tpu.pipeline_mode<synchronous>, transform_indices = @transform_3, window_bounds = array<i64: 4, 1>}, {pipeline_mode = #tpu.pipeline_mode<synchronous>, transform_indices = @transform_4, window_bounds = array<i64: 4, 36>}, {pipeline_mode = #tpu.pipeline_mode<synchronous>, transform_indices = @transform_5, window_bounds = array<i64: 4, 1>}, {transform_indices = @transform_6, window_bounds = array<i64: 1, 4, 256>}]} {
    %0 = tpu.iota {dimensions = array<i32: 1>} : vector<1x256xi32>
    %c16_i32 = arith.constant 16 : i32
    %c0_i32 = arith.constant 0 : i32
    %1 = arith.cmpi eq, %c16_i32, %c0_i32 : i32
    %c1_i32 = arith.constant 1 : i32
    %2 = arith.select %1, %c1_i32, %c16_i32 : i32
    %3 = vector.broadcast %2 : i32 to vector<1x256xi32>
    %4 = arith.remsi %0, %3 : vector<1x256xi32>
    %c0_i32_0 = arith.constant 0 : i32
    %5 = vector.broadcast %c0_i32_0 : i32 to vector<1x256xi32>
    %6 = arith.cmpi ne, %4, %5 : vector<1x256xi32>
    %c0_i32_1 = arith.constant 0 : i32
    %7 = vector.broadcast %c0_i32_1 : i32 to vector<1x256xi32>
    %8 = arith.cmpi slt, %4, %7 : vector<1x256xi32>
    %c0_i32_2 = arith.constant 0 : i32
    %9 = arith.cmpi slt, %2, %c0_i32_2 : i32
    %10 = vector.broadcast %9 : i1 to vector<1x256xi1>
    %11 = vector.broadcast %10 : vector<1x256xi1> to vector<1x256xi1>
    %12 = arith.xori %8, %11 : vector<1x256xi1>
    %13 = arith.andi %12, %6 : vector<1x256xi1>
    %14 = vector.broadcast %2 : i32 to vector<1x256xi32>
    %15 = arith.addi %4, %14 : vector<1x256xi32>
    %16 = arith.select %13, %15, %4 : vector<1x256xi1>, vector<1x256xi32>
    %c0_i32_3 = arith.constant 0 : i32
    %17 = vector.broadcast %c0_i32_3 : i32 to vector<1x256xi32>
    %18 = arith.cmpi sgt, %16, %17 : vector<1x256xi32>
    %c15_i32 = arith.constant 15 : i32
    %19 = vector.broadcast %c15_i32 : i32 to vector<1x256xi32>
    %20 = arith.cmpi slt, %16, %19 : vector<1x256xi32>
    %c0 = arith.constant 0 : index
    %c0_4 = arith.constant 0 : index
    %21 = vector.load %arg3[%c0, %c0_4] : memref<4x72xbf16, #tpu.memory_space<vmem>>, vector<4x72xbf16>
    %c0_5 = arith.constant 0 : index
    %c0_6 = arith.constant 0 : index
    %22 = vector.load %arg4[%c0_5, %c0_6] : memref<4x1xf32, #tpu.memory_space<vmem>>, vector<4x1xf32>
    %c0_7 = arith.constant 0 : index
    %c0_8 = arith.constant 0 : index
    %23 = vector.load %arg5[%c0_7, %c0_8] : memref<4x36xbf16, #tpu.memory_space<vmem>>, vector<4x36xbf16>
    %c0_9 = arith.constant 0 : index
    %c0_10 = arith.constant 0 : index
    %24 = vector.load %arg6[%c0_9, %c0_10] : memref<4x1xf32, #tpu.memory_space<vmem>>, vector<4x1xf32>
    %c0_11 = arith.constant 0 : index
    %c0_12 = arith.constant 0 : index
    %c0_13 = arith.constant 0 : index
    %25 = vector.load %arg1[%c0_11, %c0_12, %c0_13] : memref<1x4x256xf32, #tpu.memory_space<vmem>>, vector<1x4x256xf32>
    %26 = vector.shape_cast %25 : vector<1x4x256xf32> to vector<4x256xf32>
    %c0_14 = arith.constant 0 : index
    %c0_15 = arith.constant 0 : index
    %c0_16 = arith.constant 0 : index
    %27 = vector.load %arg2[%c0_14, %c0_15, %c0_16] : memref<1x4x256xf32, #tpu.memory_space<vmem>>, vector<1x4x256xf32>
    %28 = vector.shape_cast %27 : vector<1x4x256xf32> to vector<4x256xf32>
    %29 = tpu.concatenate %26, %28 in 0 : vector<4x256xf32>, vector<4x256xf32> -> vector<8x256xf32>
    %cst = arith.constant 0.000000e+00 : f32
    %30 = vector.broadcast %cst : f32 to vector<8x17xf32>
    %31 = vector.extract_strided_slice %29 {offsets = [0, 0], sizes = [8, 239], strides = [1, 1]} : vector<8x256xf32> to vector<8x239xf32>
    %32 = tpu.concatenate %30, %31 in 1 : vector<8x17xf32>, vector<8x239xf32> -> vector<8x256xf32>
    %cst_17 = arith.constant 0.000000e+00 : f32
    %33 = vector.broadcast %cst_17 : f32 to vector<8x256xf32>
    %34 = vector.shape_cast %18 : vector<1x256xi1> to vector<1x256xi1>
    %35 = vector.broadcast %34 : vector<1x256xi1> to vector<8x256xi1>
    %36 = arith.select %35, %32, %33 : vector<8x256xi1>, vector<8x256xf32>
    %cst_18 = arith.constant 0.000000e+00 : f32
    %37 = vector.broadcast %cst_18 : f32 to vector<8x16xf32>
    %38 = vector.extract_strided_slice %29 {offsets = [0, 0], sizes = [8, 240], strides = [1, 1]} : vector<8x256xf32> to vector<8x240xf32>
    %39 = tpu.concatenate %37, %38 in 1 : vector<8x16xf32>, vector<8x240xf32> -> vector<8x256xf32>
    %cst_19 = arith.constant 0.000000e+00 : f32
    %40 = vector.broadcast %cst_19 : f32 to vector<8x15xf32>
    %41 = vector.extract_strided_slice %29 {offsets = [0, 0], sizes = [8, 241], strides = [1, 1]} : vector<8x256xf32> to vector<8x241xf32>
    %42 = tpu.concatenate %40, %41 in 1 : vector<8x15xf32>, vector<8x241xf32> -> vector<8x256xf32>
    %cst_20 = arith.constant 0.000000e+00 : f32
    %43 = vector.broadcast %cst_20 : f32 to vector<8x256xf32>
    %44 = vector.shape_cast %20 : vector<1x256xi1> to vector<1x256xi1>
    %45 = vector.broadcast %44 : vector<1x256xi1> to vector<8x256xi1>
    %46 = arith.select %45, %42, %43 : vector<8x256xi1>, vector<8x256xf32>
    %cst_21 = arith.constant 0.000000e+00 : f32
    %47 = vector.broadcast %cst_21 : f32 to vector<8x1xf32>
    %48 = vector.extract_strided_slice %29 {offsets = [0, 0], sizes = [8, 255], strides = [1, 1]} : vector<8x256xf32> to vector<8x255xf32>
    %49 = tpu.concatenate %47, %48 in 1 : vector<8x1xf32>, vector<8x255xf32> -> vector<8x256xf32>
    %cst_22 = arith.constant 0.000000e+00 : f32
    %50 = vector.broadcast %cst_22 : f32 to vector<8x256xf32>
    %51 = vector.shape_cast %18 : vector<1x256xi1> to vector<1x256xi1>
    %52 = vector.broadcast %51 : vector<1x256xi1> to vector<8x256xi1>
    %53 = arith.select %52, %49, %50 : vector<8x256xi1>, vector<8x256xf32>
    %54 = vector.extract_strided_slice %29 {offsets = [0, 1], sizes = [8, 255], strides = [1, 1]} : vector<8x256xf32> to vector<8x255xf32>
    %cst_23 = arith.constant 0.000000e+00 : f32
    %55 = vector.broadcast %cst_23 : f32 to vector<8x1xf32>
    %56 = tpu.concatenate %54, %55 in 1 : vector<8x255xf32>, vector<8x1xf32> -> vector<8x256xf32>
    %cst_24 = arith.constant 0.000000e+00 : f32
    %57 = vector.broadcast %cst_24 : f32 to vector<8x256xf32>
    %58 = vector.shape_cast %20 : vector<1x256xi1> to vector<1x256xi1>
    %59 = vector.broadcast %58 : vector<1x256xi1> to vector<8x256xi1>
    %60 = arith.select %59, %56, %57 : vector<8x256xi1>, vector<8x256xf32>
    %61 = vector.extract_strided_slice %29 {offsets = [0, 15], sizes = [8, 241], strides = [1, 1]} : vector<8x256xf32> to vector<8x241xf32>
    %cst_25 = arith.constant 0.000000e+00 : f32
    %62 = vector.broadcast %cst_25 : f32 to vector<8x15xf32>
    %63 = tpu.concatenate %61, %62 in 1 : vector<8x241xf32>, vector<8x15xf32> -> vector<8x256xf32>
    %cst_26 = arith.constant 0.000000e+00 : f32
    %64 = vector.broadcast %cst_26 : f32 to vector<8x256xf32>
    %65 = vector.shape_cast %18 : vector<1x256xi1> to vector<1x256xi1>
    %66 = vector.broadcast %65 : vector<1x256xi1> to vector<8x256xi1>
    %67 = arith.select %66, %63, %64 : vector<8x256xi1>, vector<8x256xf32>
    %68 = vector.extract_strided_slice %29 {offsets = [0, 16], sizes = [8, 240], strides = [1, 1]} : vector<8x256xf32> to vector<8x240xf32>
    %cst_27 = arith.constant 0.000000e+00 : f32
    %69 = vector.broadcast %cst_27 : f32 to vector<8x16xf32>
    %70 = tpu.concatenate %68, %69 in 1 : vector<8x240xf32>, vector<8x16xf32> -> vector<8x256xf32>
    %71 = vector.extract_strided_slice %29 {offsets = [0, 17], sizes = [8, 239], strides = [1, 1]} : vector<8x256xf32> to vector<8x239xf32>
    %cst_28 = arith.constant 0.000000e+00 : f32
    %72 = vector.broadcast %cst_28 : f32 to vector<8x17xf32>
    %73 = tpu.concatenate %71, %72 in 1 : vector<8x239xf32>, vector<8x17xf32> -> vector<8x256xf32>
    %cst_29 = arith.constant 0.000000e+00 : f32
    %74 = vector.broadcast %cst_29 : f32 to vector<8x256xf32>
    %75 = vector.shape_cast %20 : vector<1x256xi1> to vector<1x256xi1>
    %76 = vector.broadcast %75 : vector<1x256xi1> to vector<8x256xi1>
    %77 = arith.select %76, %73, %74 : vector<8x256xi1>, vector<8x256xf32>
    %78 = tpu.concatenate %36, %39, %46, %53, %29, %60, %67, %70, %77 in 0 : vector<8x256xf32>, vector<8x256xf32>, vector<8x256xf32>, vector<8x256xf32>, vector<8x256xf32>, vector<8x256xf32>, vector<8x256xf32>, vector<8x256xf32>, vector<8x256xf32> -> vector<72x256xf32>
    %79 = arith.truncf %78 : vector<72x256xf32> to vector<72x256xbf16>
    %cst_30 = arith.constant dense<0.000000e+00> : vector<4x256xf32>
    %80 = tpu.matmul %21, %79, %cst_30 {dimension_numbers = #tpu.dot_dimension_numbers<[1], [0], [0], [1], [0, 0, 1, 1], [], []>} : vector<4x72xbf16>, vector<72x256xbf16>, vector<4x256xf32> -> vector<4x256xf32>
    %81 = vector.broadcast %22 : vector<4x1xf32> to vector<4x256xf32>
    %82 = arith.addf %80, %81 : vector<4x256xf32>
    %cst_31 = arith.constant 0.000000e+00 : f32
    %83 = vector.broadcast %cst_31 : f32 to vector<4x256xf32>
    %84 = arith.cmpf oge, %82, %83 : vector<4x256xf32>
    %cst_32 = arith.constant 2.000000e-01 : f32
    %85 = vector.broadcast %cst_32 : f32 to vector<4x256xf32>
    %86 = arith.mulf %85, %82 : vector<4x256xf32>
    %87 = arith.select %84, %82, %86 : vector<4x256xi1>, vector<4x256xf32>
    %cst_33 = arith.constant 0.000000e+00 : f32
    %88 = vector.broadcast %cst_33 : f32 to vector<4x17xf32>
    %89 = vector.extract_strided_slice %87 {offsets = [0, 0], sizes = [4, 239], strides = [1, 1]} : vector<4x256xf32> to vector<4x239xf32>
    %90 = tpu.concatenate %88, %89 in 1 : vector<4x17xf32>, vector<4x239xf32> -> vector<4x256xf32>
    %cst_34 = arith.constant 0.000000e+00 : f32
    %91 = vector.broadcast %cst_34 : f32 to vector<4x256xf32>
    %92 = vector.shape_cast %18 : vector<1x256xi1> to vector<1x256xi1>
    %93 = vector.broadcast %92 : vector<1x256xi1> to vector<4x256xi1>
    %94 = arith.select %93, %90, %91 : vector<4x256xi1>, vector<4x256xf32>
    %cst_35 = arith.constant 0.000000e+00 : f32
    %95 = vector.broadcast %cst_35 : f32 to vector<4x16xf32>
    %96 = vector.extract_strided_slice %87 {offsets = [0, 0], sizes = [4, 240], strides = [1, 1]} : vector<4x256xf32> to vector<4x240xf32>
    %97 = tpu.concatenate %95, %96 in 1 : vector<4x16xf32>, vector<4x240xf32> -> vector<4x256xf32>
    %cst_36 = arith.constant 0.000000e+00 : f32
    %98 = vector.broadcast %cst_36 : f32 to vector<4x15xf32>
    %99 = vector.extract_strided_slice %87 {offsets = [0, 0], sizes = [4, 241], strides = [1, 1]} : vector<4x256xf32> to vector<4x241xf32>
    %100 = tpu.concatenate %98, %99 in 1 : vector<4x15xf32>, vector<4x241xf32> -> vector<4x256xf32>
    %cst_37 = arith.constant 0.000000e+00 : f32
    %101 = vector.broadcast %cst_37 : f32 to vector<4x256xf32>
    %102 = vector.shape_cast %20 : vector<1x256xi1> to vector<1x256xi1>
    %103 = vector.broadcast %102 : vector<1x256xi1> to vector<4x256xi1>
    %104 = arith.select %103, %100, %101 : vector<4x256xi1>, vector<4x256xf32>
    %cst_38 = arith.constant 0.000000e+00 : f32
    %105 = vector.broadcast %cst_38 : f32 to vector<4x1xf32>
    %106 = vector.extract_strided_slice %87 {offsets = [0, 0], sizes = [4, 255], strides = [1, 1]} : vector<4x256xf32> to vector<4x255xf32>
    %107 = tpu.concatenate %105, %106 in 1 : vector<4x1xf32>, vector<4x255xf32> -> vector<4x256xf32>
    %cst_39 = arith.constant 0.000000e+00 : f32
    %108 = vector.broadcast %cst_39 : f32 to vector<4x256xf32>
    %109 = vector.shape_cast %18 : vector<1x256xi1> to vector<1x256xi1>
    %110 = vector.broadcast %109 : vector<1x256xi1> to vector<4x256xi1>
    %111 = arith.select %110, %107, %108 : vector<4x256xi1>, vector<4x256xf32>
    %112 = vector.extract_strided_slice %87 {offsets = [0, 1], sizes = [4, 255], strides = [1, 1]} : vector<4x256xf32> to vector<4x255xf32>
    %cst_40 = arith.constant 0.000000e+00 : f32
    %113 = vector.broadcast %cst_40 : f32 to vector<4x1xf32>
    %114 = tpu.concatenate %112, %113 in 1 : vector<4x255xf32>, vector<4x1xf32> -> vector<4x256xf32>
    %cst_41 = arith.constant 0.000000e+00 : f32
    %115 = vector.broadcast %cst_41 : f32 to vector<4x256xf32>
    %116 = vector.shape_cast %20 : vector<1x256xi1> to vector<1x256xi1>
    %117 = vector.broadcast %116 : vector<1x256xi1> to vector<4x256xi1>
    %118 = arith.select %117, %114, %115 : vector<4x256xi1>, vector<4x256xf32>
    %119 = vector.extract_strided_slice %87 {offsets = [0, 15], sizes = [4, 241], strides = [1, 1]} : vector<4x256xf32> to vector<4x241xf32>
    %cst_42 = arith.constant 0.000000e+00 : f32
    %120 = vector.broadcast %cst_42 : f32 to vector<4x15xf32>
    %121 = tpu.concatenate %119, %120 in 1 : vector<4x241xf32>, vector<4x15xf32> -> vector<4x256xf32>
    %cst_43 = arith.constant 0.000000e+00 : f32
    %122 = vector.broadcast %cst_43 : f32 to vector<4x256xf32>
    %123 = vector.shape_cast %18 : vector<1x256xi1> to vector<1x256xi1>
    %124 = vector.broadcast %123 : vector<1x256xi1> to vector<4x256xi1>
    %125 = arith.select %124, %121, %122 : vector<4x256xi1>, vector<4x256xf32>
    %126 = vector.extract_strided_slice %87 {offsets = [0, 16], sizes = [4, 240], strides = [1, 1]} : vector<4x256xf32> to vector<4x240xf32>
    %cst_44 = arith.constant 0.000000e+00 : f32
    %127 = vector.broadcast %cst_44 : f32 to vector<4x16xf32>
    %128 = tpu.concatenate %126, %127 in 1 : vector<4x240xf32>, vector<4x16xf32> -> vector<4x256xf32>
    %129 = vector.extract_strided_slice %87 {offsets = [0, 17], sizes = [4, 239], strides = [1, 1]} : vector<4x256xf32> to vector<4x239xf32>
    %cst_45 = arith.constant 0.000000e+00 : f32
    %130 = vector.broadcast %cst_45 : f32 to vector<4x17xf32>
    %131 = tpu.concatenate %129, %130 in 1 : vector<4x239xf32>, vector<4x17xf32> -> vector<4x256xf32>
    %cst_46 = arith.constant 0.000000e+00 : f32
    %132 = vector.broadcast %cst_46 : f32 to vector<4x256xf32>
    %133 = vector.shape_cast %20 : vector<1x256xi1> to vector<1x256xi1>
    %134 = vector.broadcast %133 : vector<1x256xi1> to vector<4x256xi1>
    %135 = arith.select %134, %131, %132 : vector<4x256xi1>, vector<4x256xf32>
    %136 = tpu.concatenate %94, %97, %104, %111, %87, %118, %125, %128, %135 in 0 : vector<4x256xf32>, vector<4x256xf32>, vector<4x256xf32>, vector<4x256xf32>, vector<4x256xf32>, vector<4x256xf32>, vector<4x256xf32>, vector<4x256xf32>, vector<4x256xf32> -> vector<36x256xf32>
    %137 = arith.truncf %136 : vector<36x256xf32> to vector<36x256xbf16>
    %cst_47 = arith.constant dense<0.000000e+00> : vector<4x256xf32>
    %138 = tpu.matmul %23, %137, %cst_47 {dimension_numbers = #tpu.dot_dimension_numbers<[1], [0], [0], [1], [0, 0, 1, 1], [], []>} : vector<4x36xbf16>, vector<36x256xbf16>, vector<4x256xf32> -> vector<4x256xf32>
    %139 = vector.broadcast %24 : vector<4x1xf32> to vector<4x256xf32>
    %140 = arith.addf %138, %139 : vector<4x256xf32>
    %cst_48 = arith.constant 0.000000e+00 : f32
    %141 = vector.broadcast %cst_48 : f32 to vector<4x256xf32>
    %142 = arith.subf %141, %140 : vector<4x256xf32>
    %143 = math.exp %142 : vector<4x256xf32>
    %cst_49 = arith.constant 1.000000e+00 : f32
    %144 = vector.broadcast %cst_49 : f32 to vector<4x256xf32>
    %145 = arith.addf %144, %143 : vector<4x256xf32>
    %cst_50 = arith.constant 1.000000e+00 : f32
    %146 = vector.broadcast %cst_50 : f32 to vector<4x256xf32>
    %147 = arith.divf %146, %145 : vector<4x256xf32>
    %148 = arith.mulf %26, %147 : vector<4x256xf32>
    %c0_51 = arith.constant 0 : index
    %c0_52 = arith.constant 0 : index
    %c0_53 = arith.constant 0 : index
    %149 = vector.load %arg7[%c0_51, %c0_52, %c0_53] : memref<1x4x256xf32, #tpu.memory_space<vmem>>, vector<1x4x256xf32>
    %150 = vector.shape_cast %149 : vector<1x4x256xf32> to vector<4x256xf32>
    %151 = vector.shape_cast %148 : vector<4x256xf32> to vector<1x4x256xf32>
    tpu.vector_store %arg7[%c0_51, %c0_52, %c0_53], %151 {strides = array<i32>} : memref<1x4x256xf32, #tpu.memory_space<vmem>>, vector<1x4x256xf32>,
    return
  }
  func.func @transform_0(%arg0: i32) -> (i32, i32, i32) {
    %c0_i32 = arith.constant 0 : i32
    %c0_i32_0 = arith.constant 0 : i32
    %c0_i32_1 = arith.constant 0 : i32
    return %arg0, %c0_i32, %c0_i32_0 : i32, i32, i32
  }
  func.func @transform_1(%arg0: i32) -> (i32, i32, i32) {
    %c0_i32 = arith.constant 0 : i32
    %c0_i32_0 = arith.constant 0 : i32
    %c0_i32_1 = arith.constant 0 : i32
    return %arg0, %c0_i32, %c0_i32_0 : i32, i32, i32
  }
  func.func @transform_2(%arg0: i32) -> (i32, i32) {
    %c0_i32 = arith.constant 0 : i32
    %c0_i32_0 = arith.constant 0 : i32
    %c0_i32_1 = arith.constant 0 : i32
    return %c0_i32, %c0_i32_0 : i32, i32
  }
  func.func @transform_3(%arg0: i32) -> (i32, i32) {
    %c0_i32 = arith.constant 0 : i32
    %c0_i32_0 = arith.constant 0 : i32
    %c0_i32_1 = arith.constant 0 : i32
    return %c0_i32, %c0_i32_0 : i32, i32
  }
  func.func @transform_4(%arg0: i32) -> (i32, i32) {
    %c0_i32 = arith.constant 0 : i32
    %c0_i32_0 = arith.constant 0 : i32
    %c0_i32_1 = arith.constant 0 : i32
    return %c0_i32, %c0_i32_0 : i32, i32
  }
  func.func @transform_5(%arg0: i32) -> (i32, i32) {
    %c0_i32 = arith.constant 0 : i32
    %c0_i32_0 = arith.constant 0 : i32
    %c0_i32_1 = arith.constant 0 : i32
    return %c0_i32, %c0_i32_0 : i32, i32
  }
  func.func @transform_6(%arg0: i32) -> (i32, i32, i32) {
    %c0_i32 = arith.constant 0 : i32
    %c0_i32_0 = arith.constant 0 : i32
    %c0_i32_1 = arith.constant 0 : i32
    return %arg0, %c0_i32, %c0_i32_0 : i32, i32, i32
  }
}

</mosaic_0001>

<bundles_post_ra>
// kernel: tpu_custom_call.1
= control target key start
LH: loop header
LB: loop body
LE: loop exit
PB: predicated region body
PF: predicated region fallthrough
CT: control target
= control target key end

     0   :  { %11 = vsyncpa [#allocation3], 0  ;;  %s1582_s0 = inlined_call_operand.hbm [shape: f32[2,4,256], index: 0, kind: input, shape index: {}]   ;;  %s1583_s1 = inlined_call_operand.hbm [shape: f32[2,4,256], index: 1, kind: input, shape index: {}]   ;;  %s1584_s2 = inlined_call_operand.vmem [shape: bf16[4,72], index: 2, kind: input, shape index: {}]   ;;  %s1585_s3 = inlined_call_operand.vmem [shape: f32[4,1], index: 3, kind: input, shape index: {}]   ;;  %s1586_s4 = inlined_call_operand.vmem [shape: bf16[4,36], index: 4, kind: input, shape index: {}]   ;;  %s1587_s5 = inlined_call_operand.vmem [shape: f32[4,1], index: 5, kind: input, shape index: {}]   ;;  %s1588_s6 = inlined_call_operand.hbm [shape: f32[2,4,256], index: 6, kind: output, shape index: {}]  }
   0x1   :  { %13 = vsyncpa [#allocation3 + $0x1], 0 }
   0x2   :  { %14 = vsyncpa [#allocation6], 0 }
   0x3   :  { %16 = vsyncpa [#allocation6 + $0x1], 0 }
   0x4   :  { %17 = vsyncpa [#allocation4], 0 }
   0x5   :  { %19 = vsyncpa [#allocation4 + $0x1], 0  ;;  %s1196_s21 = smov 0   ;;  %s1198_s22 = smov 0  }
   0x6   :  { %s1200_s23 = smov 0   ;;  %s1202_s24 = smov 0  }
   0x7 LB: > { %s1217_s25 = sadd.s32 4294967295, %s1146_s24   ;;  %s814_s26 = sadd.s32 4294967294, %s1146_s24   ;;  %s1146_s24 = sphi %s1202_s24, %s1623_s24   ;;  %s1142_s23 = sphi %s1200_s23, %s1622_s23   ;;  %s1138_s22 = sphi %s1198_s22, %s1621_s22   ;;  %s1134_s21 = sphi %s1196_s21, %s1620_s21  }
   0x8   : > { %s1221_s27 = sadd.s32 1, %s1146_s24   ;;  %s32_s28 = sadd.s32 1, %s1142_s23 }
   0x9   : > { %s29_s29 = ssub.s32 %s1146_s24, %s1221_s27  ;;  %p39_p0 = scmp.ne.s32.totalorder %s1142_s23, %s1138_s22 }
   0xa   : > { %p30_p1 = scmp.eq.s32.totalorder %s29_s29, 0  ;;  %p40_p2 = scmp.eq.s32.totalorder %s1146_s24, 0 }
   0xb   : > { %p45_p3 = scmp.ne.s32.totalorder %s1138_s22, %s1134_s21  ;;  %p46_p4 = scmp.eq.s32.totalorder %s1217_s25, 0 }
   0xc   : > { %s1233_s30 = scalar_select %p30_p1, %s1142_s23, %s32_s28  }
   0xd   : > { %p1235_p5 = por %p40_p2, %p39_p0  ;;  %p1239_p6 = por %p46_p4, %p45_p3 }
   0xe   : > { %p179_p7 = scmp.eq.s32.totalorder %s1217_s25, 1  ;;  %p185_p8 = scmp.eq.s32.totalorder %s814_s26, 1 }
   0xf   : > { %s1594_s8 = scalar_select %p1239_p6, 1, 0 }
  0x10   : > { %p881_p10 = scmp.lt.s32.totalorder %s1146_s24, 2  ;;  %p1246_p11 = por %p179_p7, %p39_p0 }
  0x11   : > { %p1250_p12 = por %p185_p8, %p45_p3  ;;  %s1255_s11 = sand.u32 1, %s1142_s23  }
  0x12   : > { %s1595_s9 = scalar_select %p1246_p11, 1, 0 }
  0x13   : > { %s1596_s10 = scalar_select %p1250_p12, 1, 0 }
  0x14   : > { %s861_s12 = sshll.u32 %s1146_s24, 7  ;;  %s817_s13 = sshll.u32 %s1255_s11, 3 }
  0x15   : > { %s1264_s16 = scalar_lea.hbm %s1582_s0, %s861_s12  ;;  %s221_s17 = scalar_lea.vmem [#allocation2], %s817_s13 }
  0x16   : > { %s229_s18 = sshll.u32 %s221_s17, 4  ;;  %p1270_p13 = pnand %p881_p10, %p1235_p5  ;;  %s1274_s18 = int_to_ptr.vmem [resolvable:$true] %s229_s18 }
  0x17   : > { %s218_s20 = scalar_lea.sflag [#allocation3], %s1255_s11  ;;  %s1016_s26 = scalar_lea.hbm %s1264_s16, 128 }
  0x18   : > { %p1017_p2 = scmp.ne.s32.totalorder %s1264_s16, %s1016_s26  ;;  %p1018_p3 = pneg %p1270_p13 }
  0x19   : > { %s1021_s7 = scalar_lea.hbm %s1582_s0, 256  ;;  %p1022_p5 = scmp.lt.u32.totalorder %s1264_s16, %s1582_s0 }
  0x1a   : > { %p1019_p4 = pnand %p1018_p3, %p1017_p2  ;;  %p1023_p8 = scmp.lt.u32.totalorder %s1021_s7, %s1016_s26 }
  0x1b   : > { %p1025_p9 = scmp.lt.u32.totalorder %s1016_s26, %s1264_s16 }
  0x1c   : > { %p1020_p7 = pneg %p1019_p4  ;;  %p1024_p10 = por %p1023_p8, %p1022_p5 }
  0x1e   : > { %p1026_p0 = por %p1025_p9, %p1024_p10 }
  0x20   : > { %p1027_p1 = pnand %p1026_p0, %p1020_p7 }
  0x22   : > { %1030 = shalt.err (!%p1027_p1)
}
  0x23   : > { %s1031_s17 = scalar_lea.vmem %s1274_s18, 128  ;;  %s1148_s28 = smov [#allocation2]  }
  0x24   : > { %p1032_p2 = scmp.ne.s32.totalorder %s1274_s18, %s1031_s17  ;;  %s1036_s29 = sshll.u32 %s1148_s28, 4  ;;  %s1037_s29 = int_to_ptr.vmem [resolvable:$false] %s1036_s29 }
  0x25   : > { %s1038_s14 = scalar_lea.vmem %s1037_s29, 256  ;;  %p1039_p11 = scmp.lt.s32.totalorder %s1274_s18, %s1037_s29 }
  0x26   : > { %p1034_p4 = pnand %p1032_p2, %p1018_p3  ;;  %p1040_p5 = scmp.lt.s32.totalorder %s1038_s14, %s1031_s17 }
  0x28   : > { %p1035_p12 = pneg %p1034_p4  ;;  %p1041_p8 = por %p1040_p5, %p1039_p11 }
  0x2a   : > { %p1042_p9 = pnand %p1041_p8, %p1035_p12 }
  0x2c   : > { %1045 = shalt.err (!%p1042_p9)
}
  0x2d   : > { %873 = dma.hbm_to_vmem [thread:$0]  (!%p1270_p13), %s1264_s16, 128, %s1274_s18, %s218_s20  }
  0x2e   : > { %p1598_p0 = scmp.lt.s32.totalorder %s1146_s24, 3  ;;  %p1599_p1 = scmp.ge.s32.totalorder %s1146_s24, 1 }
  0x2f   : > { %s1317_s17 = scalar_lea.hbm %s1583_s1, %s861_s12  ;;  %s240_s28 = scalar_lea.vmem [#allocation5], %s817_s13 }
  0x30   : > { %p1308_p7 = pnand %p1599_p1, %p1598_p0  ;;  %s248_s29 = sshll.u32 %s240_s28, 4  ;;  %s249_s29 = int_to_ptr.vmem [resolvable:$true] %s248_s29 }
  0x31   : > { %s237_s16 = scalar_lea.sflag [#allocation6], %s1255_s11  ;;  %s1046_s18 = scalar_lea.hbm %s1317_s17, 128 }
  0x32   : > { %s1600_s26 = scalar_select %p1308_p7, 1, 0 }
  0x33   : > { %p1047_p11 = scmp.ne.s32.totalorder %s1317_s17, %s1046_s18  ;;  %s1051_s12 = scalar_lea.hbm %s1583_s1, 256 }
  0x34   : > { %p1052_p2 = scmp.lt.u32.totalorder %s1317_s17, %s1583_s1  ;;  %p1053_p4 = scmp.lt.u32.totalorder %s1051_s12, %s1046_s18 }
  0x35   : > { %p1049_p12 = pnand %p1047_p11, %p1018_p3  ;;  %p1055_p8 = scmp.lt.u32.totalorder %s1046_s18, %s1317_s17 }
  0x36   : > { %p1054_p5 = por %p1053_p4, %p1052_p2 }
  0x37   : > { %p1050_p10 = pneg %p1049_p12 }
  0x38   : > { %p1056_p9 = por %p1055_p8, %p1054_p5 }
  0x3a   : > { %p1057_p0 = pnand %p1056_p9, %p1050_p10 }
  0x3c   : > { %1060 = shalt.err (!%p1057_p0)
}
  0x3d   : > { %s1061_s11 = scalar_lea.vmem %s249_s29, 128  ;;  %s1149_s13 = smov [#allocation5]  }
  0x3e   : > { %p1062_p1 = scmp.ne.s32.totalorder %s249_s29, %s1061_s11  ;;  %s1066_s28 = sshll.u32 %s1149_s13, 4  ;;  %s1067_s28 = int_to_ptr.vmem [resolvable:$false] %s1066_s28 }
  0x3f   : > { %s1068_s20 = scalar_lea.vmem %s1067_s28, 256  ;;  %p1069_p6 = scmp.lt.s32.totalorder %s249_s29, %s1067_s28 }
  0x40   : > { %p1064_p11 = pnand %p1062_p1, %p1018_p3  ;;  %p1070_p7 = scmp.lt.s32.totalorder %s1068_s20, %s1061_s11 }
  0x42   : > { %p1065_p12 = pneg %p1064_p11  ;;  %p1071_p2 = por %p1070_p7, %p1069_p6 }
  0x44   : > { %p1072_p4 = pnand %p1071_p2, %p1065_p12 }
  0x46   : > { %1075 = shalt.err (!%p1072_p4)
}
  0x47   : > { %876 = dma.hbm_to_vmem [thread:$0]  (!%p1270_p13), %s1317_s17, 128, %s249_s29, %s237_s16  }
  0x48   : > { %p1601_p10 = scmp.ne.s32.totalorder %s1600_s26, 0 }
  0x49   : > { %s1344_s18 = sand.u32 (!%p1601_p10), 1, %s1138_s22   ;;  %p1602_p6 = scmp.ne.s32.totalorder (!%p1601_p10), %s1594_s8, 0 }
  0x4a   : > { %257 = sbr.rel (%p1601_p10) target bundleno = 858 (0x35a), region = 44  ;;  %s1347_s14 = sshll.u32 (!%p1601_p10), %s1344_s18, 3 }
  0x4b   : > { %s260_s12 = scalar_lea.sflag (!%p1601_p10), [#allocation3], %s1344_s18  ;;  %s263_s7 = scalar_lea.vmem (!%p1601_p10), [#allocation2], %s1347_s14 }
  0x51   : > { %1121 = dma.done.wait (%p1602_p6), %s260_s12, 128  }
  0x52   : > { %1123 = vsyncadd (%p1602_p6), %s260_s12, 4294967168  ;;  %s269_s19 = scalar_lea.sflag [#allocation6], %s1344_s18  ;;  %s272_s26 = scalar_lea.vmem [#allocation5], %s1347_s14 }
  0x53   : > { %1125 = dma.done.wait (%p1602_p6), %s269_s19, 128  }
  0x54   : > { %1127 = vsyncadd (%p1602_p6), %s269_s19, 4294967168  ;;  %v1361_v0 = vld [vmem:[%s263_s7] sm:$0xff]  ;;  %v343_v1 = vld [vmem:[%s272_s26] sm:$0xff]  ;;  %vm350_vm0 = vcmask 1043456   ;;  %s1150_s8 = smov 15   ;;  %s1151_s17 = smov 17   ;;  %v307_v10 = vlaneseq }
  0x55   : > { %v345_v2 = vcombine.high %v1361_v0, %v1361_v0  ;;  %v348_v3 = vcombine.low %v343_v1, %v343_v1  ;;  %s1152_s29 = smov 1   ;;  %s1153_s16 = smov 16   ;;  %v1158_v8 = vmov 0   ;;  %v339_v9 = vld [vmem:[%s1585_s3] sm:$0xf]  ;;  %vm1591_vm1 = vcmask 121856  }
  0x56   : > { %s1154_s15 = smov 127   ;;  %s1155_s11 = smov 113   ;;  %504 = vmatprep.mubr.bf16.mxu0 %v1158_v8  ;;  %965 = vset.pattern.permute.xlu0 %v1158_v8  ;;  %v308_v11 = vand.u32 127, %v307_v10  ;;  %vm359_vm2 = vcmask 138240   ;;  %vm398_vm3 = vcmask 7168   ;;  %vm1592_vm5 = vcmask 130048  }
  0x57   : > { %v1367_v4 = vsel %vm350_vm0, %v1361_v0, %v348_v3  ;;  %v1370_v5 = vsel %vm350_vm0, %v345_v2, %v343_v1  ;;  %s1156_s13 = smov 112   ;;  %s1157_s28 = smov 111   ;;  %679 = vmatprep.mubr.bf16.mxu1 %v1158_v8  ;;  %vm1396_vm7 = vmneg %vm1592_vm5  ;;  %vm409_vm8 = vcmask 1039360   ;;  %vm1159_vm11 = vmmov 1   ;;  %v338_v8 = vld [vmem:[%s1584_s2] sm:$0x3] }
  0x58   : > { %v935_v6 = vpack.i.bf16 %v1370_v5, %v1367_v4  ;;  %v945_v7 = vpack.i.bf16 %v1367_v4, %v1370_v5  ;;  %v309_v12 = vadd.s32 128, %v308_v11  ;;  %v314_v16 = vand.u32 15, %v308_v11  ;;  %s707_s12 = scalar_lea.sflag [#allocation4], %s1344_s18  ;;  %p1617_p3 = scmp.ne.s32.totalorder %s1595_s9, 0 }
  0x59   : > { %vm420_vm15 = vcmask 924672  }
  0x5a   : > { %936 = vrot.lane.b32.xlu1 %v935_v6, %s1150_s8  ;;  %926 = vrot.lane.b32.xlu0 %v935_v6, %s1151_s17  ;;  %v321_v15 = vand.u32 15, %v309_v12  ;;  %vm1391_vm6 = vcmp.gt.s32.totalorder %v314_v16, 0  ;;  %vm1404_vm10 = vcmp.lt.s32.totalorder %v314_v16, 15 }
  0x5b   : > { %vm831_vm13 = vmpackc.low %vm1396_vm7, %vm1391_vm6 }
  0x5c   : > { %vm1387_vm4 = vcmp.gt.s32.totalorder %v321_v15, 0  ;;  %vm1400_vm9 = vcmp.lt.s32.totalorder %v321_v15, 15  ;;  %vm837_vm7 = vmpackc.low %vm1391_vm6, %vm1404_vm10 }
  0x5d   : > { %vm827_vm12 = vmpackc.low %vm1159_vm11, %vm1387_vm4 }
  0x5e   : > { %941 = vrot.lane.b32.xlu1 %v935_v6, %s1152_s29  ;;  %931 = vrot.lane.b32.xlu0 %v935_v6, %s1153_s16  ;;  %vm834_vm14 = vmpackc.low %vm1387_vm4, %vm1400_vm9 }
  0x62   : > { %946 = vrot.lane.b32.xlu0 %v945_v7, %s1154_s15  ;;  %951 = vrot.lane.b32.xlu1 %v945_v7, %s1155_s11 }
  0x66   : > { %956 = vrot.lane.b32.xlu0 %v935_v6, %s1156_s13  ;;  %961 = vrot.lane.b32.xlu1 %v935_v6, %s1157_s28 }
  0x6a   : > { %459 = vperm.xlu0 %965, %v339_v9  }
  0xcc   : > { %v937_v13 = vpop.permute.xlu1 %936  ;;  %v927_v14 = vpop.permute.xlu0 %926 }
  0xcd   : > { %v939_v17 = vunpack.i.h.bf16 %v937_v13  ;;  %v938_v18 = vunpack.i.l.bf16 %v937_v13  ;;  %v929_v19 = vunpack.i.h.bf16 %v927_v14  ;;  %v928_v20 = vunpack.i.l.bf16 %v927_v14 }
  0xcf   : > { %v384_v32 = vsel %vm1591_vm1, %v938_v18, %v939_v17  ;;  %v360_v34 = vsel %vm359_vm2, %v928_v20, %v929_v19  ;;  %v387_v36 = vsel %vm1591_vm1, 0.0, %v938_v18  ;;  %v363_v37 = vsel %vm359_vm2, 0.0, %v928_v20 }
  0xd0   : > { %v942_v21 = vpop.permute.xlu1 %941  ;;  %v932_v22 = vpop.permute.xlu0 %931  ;;  %vm440_vm1 = vcmask 908288  }
  0xd1   : > { %v944_v25 = vunpack.i.h.bf16 %v942_v21  ;;  %v943_v26 = vunpack.i.l.bf16 %v942_v21  ;;  %v934_v27 = vunpack.i.h.bf16 %v932_v22  ;;  %v933_v28 = vunpack.i.l.bf16 %v932_v22  ;;  %v341_v22 = vld [vmem:[%s1587_s5] sm:$0xf] }
  0xd3   : > { %v399_v33 = vsel %vm398_vm3, %v943_v26, %v944_v25  ;;  %v375_v35 = vsel %vm1592_vm5, %v933_v28, %v934_v27  ;;  %v402_v38 = vsel %vm398_vm3, 0.0, %v943_v26  ;;  %v832_v42 = vpack.c.bf16 %v933_v28, %v363_v37 }
  0xd4   : > { %v828_v39 = vpack.c.bf16 %v375_v35, %v360_v34  ;;  %v947_v40 = vpop.permute.xlu0 %946  ;;  %v952_v41 = vpop.permute.xlu1 %951  ;;  %v835_v46 = vpack.c.bf16 %v399_v33, %v384_v32  ;;  %v838_v48 = vpack.c.bf16 %v402_v38, %v387_v36 }
  0xd5   : > { %v949_v43 = vunpack.i.h.bf16 %v947_v40  ;;  %v948_v44 = vunpack.i.l.bf16 %v947_v40  ;;  %v953_v45 = vunpack.i.l.bf16 %v952_v41  ;;  %v954_v57 = vunpack.i.h.bf16 %v952_v41 }
  0xd6   : > { %829 = vmatprep.subr.msk.bf16.mxu0 %vm827_vm12, %v828_v39  ;;  %vm840_vm12 = vmpackc.low %vm1400_vm9, %vm1159_vm11 }
  0xd7   : > { %v413_v47 = vsel %vm409_vm8, %v948_v44, 0.0  ;;  %833 = vmatpush1.bf16.msk.msra.mxu0 %vm831_vm13, %v832_v42  ;;  %v410_v49 = vsel %vm409_vm8, %v949_v43, %v948_v44  ;;  %v424_v53 = vsel %vm420_vm15, %v953_v45, 0.0  ;;  %vm431_vm13 = vcmask 916480  }
  0xd8   : > { %v841_v50 = vpack.c.bf16 %v413_v47, %v1370_v5  ;;  %836 = vmatprep.subr.msk.bf16.mxu0 %vm834_vm14, %v835_v46  ;;  %v957_v51 = vpop.permute.xlu0 %956  ;;  %v962_v52 = vpop.permute.xlu1 %961  ;;  %v844_v59 = vpack.c.bf16 %v410_v49, %v1367_v4  ;;  %vm843_vm14 = vmpackc.low %vm1404_vm10, %vm1159_vm11  ;;  %v421_v2 = vsel %vm420_vm15, %v954_v57, %v953_v45 }
  0xd9   : > { %v959_v54 = vunpack.i.h.bf16 %v957_v51  ;;  %v964_v55 = vunpack.i.h.bf16 %v962_v52  ;;  %v963_v56 = vunpack.i.l.bf16 %v962_v52  ;;  %v958_v58 = vunpack.i.l.bf16 %v957_v51  ;;  %vm846_vm5 = vmpackc.low %vm431_vm13, %vm1387_vm4 }
  0xdb   : > { %839 = vmatpush1.bf16.msk.msra.mxu0 %vm837_vm7, %v838_v48  ;;  %v444_v60 = vsel %vm440_vm1, %v964_v55, 0.0  ;;  %v441_v61 = vsel %vm440_vm1, %v963_v56, %v964_v55  ;;  %v847_v62 = vpack.c.bf16 %v959_v54, %v424_v53  ;;  %v432_v3 = vsel %vm431_vm13, %v958_v58, %v959_v54  ;;  %vm849_vm7 = vmpackc.low %vm1159_vm11, %vm1391_vm6 }
  0xdc   : > { %842 = vmatprep.subr.msk.bf16.mxu0 %vm840_vm12, %v841_v50  ;;  %v446_v63 = vsel %vm1400_vm9, %v444_v60, 0.0  ;;  %v445_v1 = vsel %vm1404_vm10, %v441_v61, 0.0  ;;  %v850_v6 = vpack.c.bf16 %v432_v3, %v421_v2  ;;  %vm462_vm12 = vcmask 588800  }
  0xdd   : > { %v456_v4 = vpack.c.bf16 %v446_v63, %v446_v63  ;;  %v455_v5 = vpack.c.bf16 %v445_v1, %v445_v1 }
  0xdf   : > { %845 = vmatpush1.bf16.msk.msra.mxu0 %vm843_vm14, %v844_v59  ;;  %v467_v7 = vsel %vm350_vm0, %v455_v5, 0  ;;  %vm1613_vm14 = vcmask 130048  }
  0xe0   : > { %848 = vmatprep.subr.msk.bf16.mxu0 %vm846_vm5, %v847_v62 }
  0xe3   : > { %851 = vmatpush1.bf16.msk.msra.mxu0 %vm849_vm7, %v850_v6 }
  0xe4   : > { %852 = vmatprep.subr.msk.bf16.mxu0 %vm350_vm0, %v456_v4 }
  0xe7   : > { %481 = vmatpush1.bf16.msra.mxu0 %v467_v7 }
  0xe9   : > { %v460_v9 = vpop.permute.xlu0 %459 }
  0xea   : > { %853 = vmatmul.mubr.msk.bf16.vlgmr.msra.gmra.mrb[0].mxu0 %vm462_vm12, %v338_v8 }
 0x1bd   : > { %v506_v10 = vpop.f32.mrb[0].mxu0 }
 0x1be   : > { %v507_v11 = vadd.f32 %v506_v10, %v460_v9  ;;  %v508_v12 = vpop.f32.mrb[1].mxu0 }
 0x1bf   : > { %v509_v13 = vadd.f32 %v508_v12, %v460_v9  ;;  %v510_v14 = vpop.f32.mrb[2].mxu0 }
 0x1c0   : > { %vm513_vm5 = vcmp.ge.f32.partialorder %v507_v11, 0.0  ;;  %v515_v15 = vmul.f32 0.2, %v507_v11  ;;  %v511_v16 = vpop.f32.mrb[3].mxu0 }
 0x1c1   : > { %vm514_vm11 = vcmp.ge.f32.partialorder %v509_v13, 0.0  ;;  %v516_v17 = vmul.f32 0.2, %v509_v13 }
 0x1c2   : > { %v1460_v18 = vsel %vm513_vm5, %v507_v11, %v515_v15 }
 0x1c3   : > { %v1462_v19 = vsel %vm514_vm11, %v509_v13, %v516_v17 }
 0x1c4   : > { %v976_v20 = vpack.i.bf16 %v1462_v19, %v1460_v18  ;;  %v986_v21 = vpack.i.bf16 %v1460_v18, %v1462_v19 }
 0x1c6   : > { %977 = vrot.lane.b32.xlu0 %v976_v20, %s1151_s17  ;;  %967 = vrot.lane.b32.xlu1 %v976_v20, %s1152_s29  ;;  %s863_s29 = sshll.u32 %s1217_s25, 7  ;;  %s1160_s25 = smov [#allocation7]  }
 0x1ca   : > { %987 = vrot.lane.b32.xlu0 %v986_v21, %s1154_s15  ;;  %972 = vrot.lane.b32.xlu1 %v976_v20, %s1153_s16  ;;  %s305_s16 = scalar_lea.vmem [#allocation7], %s1347_s14  ;;  %s1080_s14 = sshll.u32 %s1160_s25, 4  ;;  %s1081_s14 = int_to_ptr.vmem [resolvable:$false] %s1080_s14 }
 0x1cb   : > { %s721_s15 = sshll.u32 %s305_s16, 4  ;;  %s1082_s19 = scalar_lea.vmem %s1081_s14, 256  ;;  %s1540_s15 = int_to_ptr.vmem [resolvable:$true] %s721_s15 }
 0x1cc   : > { %s1076_s7 = scalar_lea.vmem %s1540_s15, 128  ;;  %p1083_p8 = scmp.lt.s32.totalorder %s1540_s15, %s1081_s14 }
 0x1cd   : > { %p1077_p13 = scmp.ne.s32.totalorder %s1540_s15, %s1076_s7  ;;  %p1084_p9 = scmp.lt.s32.totalorder %s1082_s19, %s1076_s7 }
 0x1ce   : > { %997 = vrot.lane.b32.xlu0 %v986_v21, %s1155_s11  ;;  %982 = vrot.lane.b32.xlu1 %v976_v20, %s1150_s8 }
 0x1cf   : > { %p1078_p7 = pnand %p1077_p13, %p1617_p3  ;;  %p1085_p0 = por %p1084_p9, %p1083_p8 }
 0x1d1   : > { %p1079_p5 = pneg %p1078_p7 }
 0x1d2   : > { %633 = vperm.xlu0 %965, %v341_v22   ;;  %992 = vrot.lane.b32.xlu1 %v986_v21, %s1156_s13 }
 0x1d3   : > { %p1086_p1 = pnand %p1085_p0, %p1079_p5 }
 0x1d6   : > { %1002 = vrot.lane.b32.xlu1 %v976_v20, %s1157_s28  ;;  %s1538_s28 = scalar_lea.hbm %s1588_s6, %s863_s29 }
 0x238   : > { %v978_v25 = vpop.permute.xlu0 %977  ;;  %v968_v26 = vpop.permute.xlu1 %967 }
 0x239   : > { %v970_v27 = vunpack.i.h.bf16 %v968_v26  ;;  %v969_v28 = vunpack.i.l.bf16 %v968_v26  ;;  %v980_v29 = vunpack.i.h.bf16 %v978_v25  ;;  %v979_v32 = vunpack.i.l.bf16 %v978_v25 }
 0x23b   : > { %v555_v33 = vsel %vm398_vm3, 0.0, %v969_v28  ;;  %v552_v36 = vsel %vm398_vm3, %v969_v28, %v970_v27  ;;  %v525_v41 = vsel %vm359_vm2, %v979_v32, %v980_v29  ;;  %v528_v42 = vsel %vm359_vm2, 0.0, %v979_v32  ;;  %vm1614_vm3 = vmmov %vm1613_vm14 }
 0x23c   : > { %v988_v34 = vpop.permute.xlu0 %987  ;;  %v973_v35 = vpop.permute.xlu1 %972  ;;  %v556_v43 = vsel %vm1391_vm6, %v555_v33, 0.0  ;;  %v557_v51 = vsel %vm1387_vm4, %v552_v36, 0.0  ;;  %v530_v55 = vsel %vm1387_vm4, %v525_v41, 0.0  ;;  %v529_v63 = vsel %vm1391_vm6, %v528_v42, 0.0  ;;  %v340_v41 = vld [vmem:[%s1586_s4] sm:$0x3] }
 0x23d   : > { %v990_v37 = vunpack.i.h.bf16 %v988_v34  ;;  %v989_v38 = vunpack.i.l.bf16 %v988_v34  ;;  %v975_v39 = vunpack.i.h.bf16 %v973_v35  ;;  %v974_v40 = vunpack.i.l.bf16 %v973_v35 }
 0x23e   : > { %v602_v60 = vrot.slane %v556_v43, 4  ;;  %v603_v62 = vrot.slane %v557_v51, 4  ;;  %vm1615_vm2 = vcmask 121856  }
 0x23f   : > { %v562_v44 = vsel %vm409_vm8, %v990_v37, %v989_v38  ;;  %v565_v45 = vsel %vm409_vm8, %v989_v38, 0.0  ;;  %v537_v47 = vsel %vm1613_vm14, 0.0, %v974_v40  ;;  %v535_v50 = vsel %vm1614_vm3, %v974_v40, %v975_v39  ;;  %vm1616_vm8 = vmmov %vm1615_vm2 }
 0x240   : > { %v566_v46 = vsel %vm1404_vm10, %v562_v44, 0.0  ;;  %v998_v48 = vpop.permute.xlu0 %997  ;;  %v983_v49 = vpop.permute.xlu1 %982  ;;  %v567_v52 = vsel %vm1400_vm9, %v565_v45, 0.0  ;;  %v596_v53 = vrot.slane %v537_v47, 4  ;;  %v597_v59 = vrot.slane %v535_v50, 4 }
 0x241   : > { %v1000_v54 = vunpack.i.h.bf16 %v998_v48  ;;  %v999_v56 = vunpack.i.l.bf16 %v998_v48  ;;  %v985_v57 = vunpack.i.h.bf16 %v983_v49  ;;  %v984_v58 = vunpack.i.l.bf16 %v983_v49 }
 0x242   : > { %v608_v61 = vrot.slane %v566_v46, 4  ;;  %v609_v1 = vrot.slane %v567_v52, 4  ;;  %v617_v5 = vsel %vm350_vm0, %v529_v63, %v596_v53  ;;  %v618_v11 = vsel %vm350_vm0, %v530_v55, %v597_v59 }
 0x243   : > { %v545_v2 = vsel %vm1615_vm2, 0.0, %v984_v58  ;;  %v542_v4 = vsel %vm1616_vm8, %v984_v58, %v985_v57  ;;  %v572_v6 = vsel %vm420_vm15, %v1000_v54, %v999_v56  ;;  %v575_v10 = vsel %vm420_vm15, %v999_v56, 0.0 }
 0x244   : > { %v993_v3 = vpop.permute.xlu1 %992  ;;  %v547_v9 = vsel %vm1400_vm9, %v542_v4, 0.0  ;;  %v546_v13 = vsel %vm1404_vm10, %v545_v2, 0.0  ;;  %v577_v26 = vsel %vm1387_vm4, %v575_v10, 0.0  ;;  %v576_v29 = vsel %vm1391_vm6, %v572_v6, 0.0 }
 0x245   : > { %v995_v7 = vunpack.i.h.bf16 %v993_v3  ;;  %v994_v8 = vunpack.i.l.bf16 %v993_v3  ;;  %v620_v12 = vsel %vm350_vm0, %v547_v9, %v603_v62  ;;  %v619_v17 = vsel %vm350_vm0, %v546_v13, %v602_v60 }
 0x246   : > { %v626_v16 = vpack.c.bf16 %v620_v12, %v618_v11  ;;  %v625_v25 = vpack.c.bf16 %v619_v17, %v617_v5  ;;  %v622_v32 = vsel %vm350_vm0, %v1462_v19, %v609_v1  ;;  %v621_v34 = vsel %vm350_vm0, %v1460_v18, %v608_v61 }
 0x247   : > { %v582_v14 = vsel %vm431_vm13, %v995_v7, %v994_v8  ;;  %v584_v15 = vsel %vm431_vm13, %v994_v8, 0.0  ;;  %vm640_vm4 = vcmask 1041408  }
 0x248   : > { %v613_v20 = vrot.slane %v582_v14, 4  ;;  %v614_v21 = vrot.slane %v584_v15, 4  ;;  %v1003_v22 = vpop.permute.xlu1 %1002  ;;  %647 = vmatprep.subr.bf16.mxu1 %v626_v16 }
 0x249   : > { %v1005_v27 = vunpack.i.h.bf16 %v1003_v22  ;;  %v1004_v28 = vunpack.i.l.bf16 %v1003_v22  ;;  %648 = vmatpush1.bf16.msra.mxu1 %v625_v25 }
 0x24a   : > { %v624_v33 = vsel %vm350_vm0, %v577_v26, %v614_v21  ;;  %v623_v35 = vsel %vm350_vm0, %v576_v29, %v613_v20  ;;  %vm636_vm0 = vcmask 293888  }
 0x24b   : > { %v592_v23 = vsel %vm440_vm1, %v1005_v27, 0.0  ;;  %v628_v36 = vpack.c.bf16 %v624_v33, %v622_v32  ;;  %v627_v37 = vpack.c.bf16 %v623_v35, %v621_v34  ;;  %v589_v38 = vsel %vm440_vm1, %v1004_v28, %v1005_v27 }
 0x24c   : > { %v594_v24 = vsel %vm1400_vm9, %v592_v23, 0.0  ;;  %v593_v19 = vsel %vm1404_vm10, %v589_v38, 0.0 }
 0x24d   : > { %v630_v39 = vpack.c.bf16 %v594_v24, %v594_v24  ;;  %649 = vmatprep.subr.bf16.mxu1 %v628_v36  ;;  %v629_v40 = vpack.c.bf16 %v593_v19, %v593_v19 }
 0x24e   : > { %650 = vmatpush1.bf16.msra.mxu1 %v627_v37 }
 0x24f   : > { %854 = vmatprep.subr.msk.bf16.mxu1 %vm640_vm4, %v630_v39  ;;  %v642_v18 = vsel %vm640_vm4, %v629_v40, 0 }
 0x251   : > { %v634_v42 = vpop.permute.xlu0 %633 }
 0x252   : > { %652 = vmatpush1.bf16.msra.mxu1 %v642_v18 }
 0x255   : > { %855 = vmatmul.mubr.msk.bf16.vlgmr.msra.gmra.mrb[0].mxu1 %vm636_vm0, %v340_v41 }
 0x328   : > { %v681_v30 = vpop.f32.mrb[0].mxu1 }
 0x329   : > { %v682_v43 = vadd.f32 %v681_v30, %v634_v42  ;;  %v683_v44 = vpop.f32.mrb[1].mxu1 }
 0x32a   : > { %v684_v45 = vadd.f32 %v683_v44, %v634_v42  ;;  %v685_v31 = vpop.f32.mrb[2].mxu1 }
 0x32b   : > { %v688_v46 = vsub.f32 0.0, %v682_v43  ;;  %v686_v47 = vpop.f32.mrb[3].mxu1 }
 0x32c   : > { %v689_v48 = vsub.f32 0.0, %v684_v45 }
 0x32d   : > { %v690_v49 = vmul.f32 1.442695, %v688_v46 }
 0x32e   : > { %v692_v50 = vmul.f32 1.442695, %v689_v48 }
 0x32f   : > { %1008 = vpow2.f32 %v690_v49 }
 0x330   : > { %1010 = vpow2.f32 %v692_v50 }
 0x339   : > { %v1009_v51 = vpop.eup %1008 }
 0x33a   : > { %v1011_v52 = vpop.eup %1010  ;;  %v694_v53 = vadd.f32 1.0, %v1009_v51 }
 0x33b   : > { %v695_v54 = vadd.f32 1.0, %v1011_v52 }
 0x33c   : > { %1012 = vrcp.f32 %v694_v53 }
 0x33d   : > { %1014 = vrcp.f32 %v695_v54 }
 0x346   : > { %v1013_v55 = vpop.eup %1012 }
 0x347   : > { %v1015_v56 = vpop.eup %1014 }
 0x348   : > { %v702_v57 = vcombine.low %v1013_v55, %v1015_v56 }
 0x34a   : > { %v704_v58 = vmul.f32 %v702_v57, %v1361_v0 }
 0x34c   : > { %705 = vst [vmem:[%s305_s16] sm:$0xff] %v704_v58 }
 0x34d   : > { %1089 = shalt.err (!%p1086_p1)
}
 0x34e   : > { %s1090_s18 = scalar_lea.hbm %s1538_s28, 128  ;;  %s1094_s8 = scalar_lea.hbm %s1588_s6, 256 }
 0x34f   : > { %p1091_p11 = scmp.ne.s32.totalorder %s1538_s28, %s1090_s18  ;;  %p1095_p4 = scmp.lt.u32.totalorder %s1538_s28, %s1588_s6 }
 0x350   : > { %p1096_p10 = scmp.lt.u32.totalorder %s1094_s8, %s1090_s18  ;;  %p1098_p13 = scmp.lt.u32.totalorder %s1090_s18, %s1538_s28 }
 0x351   : > { %p1092_p12 = pnand %p1091_p11, %p1617_p3 }
 0x352   : > { %p1097_p6 = por %p1096_p10, %p1095_p4 }
 0x353   : > { %p1093_p2 = pneg %p1092_p12 }
 0x354   : > { %p1099_p7 = por %p1098_p13, %p1097_p6 }
 0x356   : > { %p1100_p5 = pnand %p1099_p7, %p1093_p2 }
 0x358   : > { %1103 = shalt.err (!%p1100_p5)
}
 0x359   : > { %868 = dma.vmem_to_hbm [thread:$0]  (%p1617_p3), %s1540_s15, 128, %s1538_s28, %s707_s12  }
 0x35a PF: > { %s733_s16 = sand.u32 1, %s1134_s21   ;;  %p1618_p8 = scmp.ne.s32.totalorder %s1596_s10, 0 }
 0x35b   : > { %p1619_p9 = scmp.ge.s32.totalorder %s1146_s24, 2  ;;  %s734_s11 = scalar_lea.sflag [#allocation4], %s733_s16 }
 0x35d   : > { %p878_p0 = pnand %p1619_p9, %p1618_p8 }
 0x35f   : > { %1129 = dma.done.wait (!%p878_p0), %s734_s11, 128  }
 0x360   : > { %1131 = vsyncadd (!%p878_p0), %s734_s11, 4294967168  ;;  %p22_p1 = scmp.ge.s32.totalorder %s1221_s27, 4   ;;  %s1620_s21 = smov %s1138_s22 }
 0x361   : > { %s1621_s22 = smov %s1142_s23  ;;  %s1622_s23 = smov %s1233_s30 }
 0x362   : > { %s1623_s24 = smov %s1221_s27  ;;  %24 = sbr.rel (!%p22_p1) target bundleno = 7 (0x7), region = 102 }
 0x369   :  { %739 = vsyncpa [#allocation3], 1 }
 0x36a   :  { %741 = vsyncpa [#allocation3 + $0x1], 1 }
 0x36b   :  { %742 = vsyncpa [#allocation6], 1 }
 0x36c   :  { %744 = vsyncpa [#allocation6 + $0x1], 1 }
 0x36d   :  { %745 = vsyncpa [#allocation4], 1 }
 0x36e   :  { %747 = vsyncpa [#allocation4 + $0x1], 1 }

</bundles_post_ra>
